<compile_context>
chip_gen: v5e
topology: v5e:2x2
jax: 0.10.0
libtpu: 0.0.40
codegen_flags: <defaults>
</compile_context>

<pallas_src>
import functools

import numpy as np
import jax
import jax.numpy as jnp
from jax.experimental import pallas as pl
from jax.experimental.pallas import tpu as pltpu

VMEM_LIMIT_BYTES = 32 * 1024 * 1024
NEG_INF = -1e30


# ----------------------------------------------------------------------------
# Kernel 1: feature projection + dst attention scores (row-tiled, pipelined)
#   h_tile    = x_tile @ W          (bf16 MXU operands, f32 accumulate)
#   sdst_tile = h_tile @ A_dst      (block-diagonal packed -> one matmul)
# ----------------------------------------------------------------------------
def proj_kernel(x_ref, w_ref, a_dst_ref, h_ref, sdst_ref):
    xb = x_ref[...].astype(jnp.bfloat16)
    wb = w_ref[...].astype(jnp.bfloat16)
    h = jnp.dot(xb, wb, preferred_element_type=jnp.float32)         # [TM, HC]
    sdst_ref[...] = jnp.dot(h, a_dst_ref[...],
                            preferred_element_type=jnp.float32)      # [TM, heads]
    h_ref[...] = h.astype(jnp.bfloat16)


# ----------------------------------------------------------------------------
# Kernel 2: block-sparse attention + aggregation with online softmax.
#   grid = (dst_tiles, max_nbr_blocks); scalar-prefetched nbr_idx / nbr_cnt
#   select which src block each inner step visits; padded steps are skipped.
# ----------------------------------------------------------------------------
def gat_attn_kernel(idx_ref, cnt_ref,                       # scalar prefetch (SMEM)
                    adj_ref, hsrc_ref, sdst_ref, asrcT_ref,
                    bias_ref, scale_ref, shift_ref,
                    out_ref,
                    m_scr, l_scr, acc_scr,
                    *, heads, ch, concat, apply_bn_elu):
    i = pl.program_id(0)
    j = pl.program_id(1)

    @pl.when(j == 0)
    def _init():
        m_scr[...] = jnp.full_like(m_scr, NEG_INF)
        l_scr[...] = jnp.zeros_like(l_scr)
        acc_scr[...] = jnp.zeros_like(acc_scr)

    # Only real (nonzero) src blocks do work; padded steps are no-ops.
    @pl.when(j < cnt_ref[i])
    def _compute():
        mask = adj_ref[...] != 0                        # int8 -> bool, no f32 copy
        h_src = hsrc_ref[...]                           # [TN, HC] bf16
        sdst = sdst_ref[...]                            # [TM, heads] f32
        # Per-src-tile attention scores, one tiny batched matmul for all heads.
        ssrcT = jax.lax.dot_general(                    # [heads, TN] f32
            asrcT_ref[...].astype(jnp.bfloat16), h_src,
            (((1,), (1,)), ((), ())), preferred_element_type=jnp.float32)

        for hd in range(heads):
            e = sdst[:, hd:hd + 1] + ssrcT[hd:hd + 1, :]          # [TM, TN]
            e = jnp.where(e >= 0.0, e, 0.2 * e)                   # LeakyReLU(0.2)
            e = jnp.where(mask, e, NEG_INF)                       # mask BEFORE max

            m_old = m_scr[:, hd:hd + 1]
            m_new = jnp.maximum(m_old, jnp.max(e, axis=1, keepdims=True))
            corr = jnp.exp(m_old - m_new)
            p = jnp.where(mask, jnp.exp(e - m_new), 0.0)          # unnormalized

            l_scr[:, hd:hd + 1] = (corr * l_scr[:, hd:hd + 1]
                                   + jnp.sum(p, axis=1, keepdims=True))
            sl = slice(hd * ch, (hd + 1) * ch)
            o = jnp.dot(p.astype(jnp.bfloat16), h_src[:, sl],
                        preferred_element_type=jnp.float32)       # [TM, ch]
            acc_scr[:, sl] = corr * acc_scr[:, sl] + o
            m_scr[:, hd:hd + 1] = m_new

    @pl.when(j == pl.num_programs(1) - 1)
    def _finalize():
        # Normalize AFTER the aggregation matmuls (per-head [TM, ch] scale).
        inv = pl.reciprocal(l_scr[...], approx=True)              # [TM, heads]
        for hd in range(heads):
            sl = slice(hd * ch, (hd + 1) * ch)
            acc_scr[:, sl] = acc_scr[:, sl] * inv[:, hd:hd + 1]
        if concat:
            out = acc_scr[...] + bias_ref[...]                    # [TM, heads*ch]
        else:
            out = acc_scr[:, 0:ch]
            for hd in range(1, heads):
                out = out + acc_scr[:, hd * ch:(hd + 1) * ch]
            out = out * (1.0 / float(heads)) + bias_ref[...]      # head mean
        if apply_bn_elu:
            out = out * scale_ref[...] + shift_ref[...]           # BN (eval affine)
            out = jnp.where(out > 0.0, out, jnp.expm1(out))       # ELU
        out_ref[...] = out.astype(out_ref.dtype)                  # one dense store


# ----------------------------------------------------------------------------
# Block-sparsity metadata (host-side preprocessing of the static graph)
# ----------------------------------------------------------------------------
def build_block_meta(adj_mask, tile_m, tile_n):
    a = np.asarray(adj_mask)
    n = a.shape[0]
    nd, ns = n // tile_m, n // tile_n
    blk = a.reshape(nd, tile_m, ns, tile_n).sum(axis=(1, 3)) > 0     # [nd, ns]
    cnts = blk.sum(axis=1).astype(np.int32)
    assert (cnts >= 1).all()          # self-loops guarantee >= 1 block per row
    max_cnt = int(cnts.max())
    idx = np.zeros((nd, max_cnt), np.int32)
    for r in range(nd):
        nz = np.nonzero(blk[r])[0].astype(np.int32)
        idx[r, :len(nz)] = nz
        idx[r, len(nz):] = nz[-1]     # repeat last index -> consecutive-DMA dedup
    return jnp.asarray(idx.reshape(-1)), jnp.asarray(cnts), max_cnt


# ----------------------------------------------------------------------------
# One GAT layer = projection call + block-sparse attention call
# ----------------------------------------------------------------------------
def gat_layer(x, adj_i8, meta, params, *, heads, ch, concat, apply_bn_elu,
              tile_m, tile_n):
    n, f_in = x.shape
    hc = heads * ch
    width = hc if concat else ch
    nbr_idx, nbr_cnt, max_cnt = meta
    nd = n // tile_m

    h, sdst = pl.pallas_call(
        proj_kernel,
        grid=(nd,),
        in_specs=[pl.BlockSpec((tile_m, f_in), lambda i: (i, 0)),
                  pl.BlockSpec((f_in, hc), lambda i: (0, 0)),
                  pl.BlockSpec((hc, heads), lambda i: (0, 0))],
        out_specs=(pl.BlockSpec((tile_m, hc), lambda i: (i, 0)),
                   pl.BlockSpec((tile_m, heads), lambda i: (i, 0))),
        out_shape=(jax.ShapeDtypeStruct((n, hc), jnp.bfloat16),
                   jax.ShapeDtypeStruct((n, heads), jnp.float32)),
        compiler_params=pltpu.CompilerParams(
            dimension_semantics=("parallel",),
            vmem_limit_bytes=VMEM_LIMIT_BYTES),
    )(x, params["w"], params["a_dst_cat"])

    def adj_map(i, j, idx_ref, cnt_ref):
        return (i, idx_ref[i * max_cnt + j])

    def hsrc_map(i, j, idx_ref, cnt_ref):
        return (idx_ref[i * max_cnt + j], 0)

    def dst_map(i, j, idx_ref, cnt_ref):
        return (i, 0)

    def const_map(i, j, idx_ref, cnt_ref):
        return (0, 0)

    kern = functools.partial(gat_attn_kernel, heads=heads, ch=ch,
                             concat=concat, apply_bn_elu=apply_bn_elu)
    return pl.pallas_call(
        kern,
        grid_spec=pltpu.PrefetchScalarGridSpec(
            num_scalar_prefetch=2,
            grid=(nd, max_cnt),
            in_specs=[
                pl.BlockSpec((tile_m, tile_n), adj_map),     # adj block (int8)
                pl.BlockSpec((tile_n, hc), hsrc_map),        # h src block (bf16)
                pl.BlockSpec((tile_m, heads), dst_map),      # dst scores
                pl.BlockSpec((heads, hc), const_map),        # a_src^T (tiny)
                pl.BlockSpec((1, width), const_map),         # bias
                pl.BlockSpec((1, width), const_map),         # bn scale
                pl.BlockSpec((1, width), const_map),         # bn shift
            ],
            out_specs=pl.BlockSpec((tile_m, width), dst_map),
            scratch_shapes=[pltpu.VMEM((tile_m, heads), jnp.float32),   # m
                            pltpu.VMEM((tile_m, heads), jnp.float32),   # l
                            pltpu.VMEM((tile_m, hc), jnp.float32)],     # acc
        ),
        out_shape=jax.ShapeDtypeStruct((n, width), jnp.float32),
        compiler_params=pltpu.CompilerParams(
            dimension_semantics=("parallel", "arbitrary"),
            vmem_limit_bytes=VMEM_LIMIT_BYTES),
    )(nbr_idx, nbr_cnt, adj_i8, h, sdst, params["a_src_catT"], params["bias"],
      params["scale"], params["shift"])


# ----------------------------------------------------------------------------
# Model wrapper (mirrors AKPGAT.forward, inference mode)
# ----------------------------------------------------------------------------
def akpgat_forward(x, adj_mask, layer_params, *, heads, hidden, out_ch,
                   tile_m=64, tile_n=128):
    n = x.shape[0]
    assert n % tile_m == 0 and n % tile_n == 0
    assert tile_m % 32 == 0 and tile_n % 128 == 0   # int8 (32,128) min tile
    adj_i8 = (adj_mask > 0).astype(jnp.int8)        # half of bf16, 1/4 of f32 bytes
    meta = build_block_meta(adj_mask, tile_m, tile_n)
    for p in layer_params[:-1]:
        x = gat_layer(x, adj_i8, meta, p, heads=heads, ch=hidden,
                      concat=True, apply_bn_elu=True,
                      tile_m=tile_m, tile_n=tile_n)
        # F.dropout(x, training=False) -> identity
    return gat_layer(x, adj_i8, meta, layer_params[-1], heads=heads, ch=out_ch,
                     concat=False, apply_bn_elu=False,
                     tile_m=tile_m, tile_n=tile_n)


# ----------------------------------------------------------------------------
# Pure-JAX f32 reference (correctness check)
# ----------------------------------------------------------------------------
def gat_layer_ref(x, adj, p, *, heads, ch, concat, apply_bn_elu):
    h = x @ p["w"]
    outs = []
    for hd in range(heads):
        hh = h[:, hd * ch:(hd + 1) * ch]
        a_src = hh @ p["att_src"][hd]
        a_dst = hh @ p["att_dst"][hd]
        e = a_dst[:, None] + a_src[None, :]
        e = jnp.where(e >= 0.0, e, 0.2 * e)
        e = jnp.where(adj > 0.0, e, -1e30)
        e = e - jnp.max(e, axis=1, keepdims=True)
        pe = jnp.exp(e)
        alpha = pe / jnp.sum(pe, axis=1, keepdims=True)
        outs.append(alpha @ hh)
    out = jnp.concatenate(outs, -1) if concat else sum(outs) / float(heads)
    out = out + p["bias"]
    if apply_bn_elu:
        out = out * p["scale"] + p["shift"]
        out = jnp.where(out > 0.0, out, jnp.expm1(out))
    return out


def akpgat_ref(x, adj, layer_params, *, heads, hidden, out_ch):
    for p in layer_params[:-1]:
        x = gat_layer_ref(x, adj, p, heads=heads, ch=hidden,
                          concat=True, apply_bn_elu=True)
    return gat_layer_ref(x, adj, layer_params[-1], heads=heads, ch=out_ch,
                         concat=False, apply_bn_elu=False)


# ----------------------------------------------------------------------------
# Deterministic parameter init (+ block-diagonal packed attention matrices)
# ----------------------------------------------------------------------------
def init_gat_params(key, f_in, ch, heads, concat):
    k1, k2, k3, k4 = jax.random.split(key, 4)
    hc = heads * ch
    width = hc if concat else ch
    w = jax.random.normal(k1, (f_in, hc), jnp.float32) / jnp.sqrt(
        jnp.float32(f_in))
    att_src = 0.1 * jax.random.normal(k2, (heads, ch), jnp.float32)
    att_dst = 0.1 * jax.random.normal(k3, (heads, ch), jnp.float32)
    bias = 0.01 * jax.random.normal(k4, (1, width), jnp.float32)
    # BatchNorm1d default init, eval mode: gamma=1, beta=0, mean=0, var=1
    eps = 1e-5
    scale = jnp.full((1, width), 1.0 / jnp.sqrt(1.0 + eps), jnp.float32)
    shift = jnp.zeros((1, width), jnp.float32)

    # Block-diagonal packing: per-head attention-vector dots -> one matmul each.
    a_dst_cat = jnp.zeros((hc, heads), jnp.float32)
    a_src_catT = jnp.zeros((heads, hc), jnp.float32)
    for hd in range(heads):
        a_dst_cat = a_dst_cat.at[hd * ch:(hd + 1) * ch, hd].set(att_dst[hd])
        a_src_catT = a_src_catT.at[hd, hd * ch:(hd + 1) * ch].set(att_src[hd])

    return dict(w=w, att_src=att_src, att_dst=att_dst, bias=bias,
                scale=scale, shift=shift,
                a_dst_cat=a_dst_cat, a_src_catT=a_src_catT)


# ----------------------------------------------------------------------------
if __name__ == "__main__":
    N = 256            # nodes
    IN_CH = 8
    HIDDEN = 16
    OUT_CH = 8
    HEADS = 2
    NUM_LAYERS = 3
    TILE_M = 64        # 4 dst tiles -> exercises megacore split + padding skip
    TILE_N = 128       # 2 src blocks -> exercises block-sparse online softmax

    key = jax.random.PRNGKey(0)
    kx, kadj, kp = jax.random.split(key, 3)

    x = jax.random.normal(kx, (N, IN_CH), jnp.float32)
    # Banded graph (includes self-loops) + random local edges; far-off-diagonal
    # (dst-tile, src-block) pairs are empty and get skipped by the kernel.
    ii = jnp.arange(N)
    dist = jnp.abs(ii[:, None] - ii[None, :])
    band = dist <= 20
    extra = (jax.random.uniform(kadj, (N, N)) < 0.3) & (dist <= 40)
    adj = (band | extra).astype(jnp.float32)

    layer_params = []
    keys = jax.random.split(kp, NUM_LAYERS)
    f_in = IN_CH
    for i in range(NUM_LAYERS - 1):
        layer_params.append(init_gat_params(keys[i], f_in, HIDDEN, HEADS, True))
        f_in = HIDDEN * HEADS
    layer_params.append(init_gat_params(keys[-1], f_in, OUT_CH, HEADS, False))

    out = akpgat_forward(x, adj, layer_params,
                         heads=HEADS, hidden=HIDDEN, out_ch=OUT_CH,
                         tile_m=TILE_M, tile_n=TILE_N)
    out = jax.block_until_ready(out)

    ref = akpgat_ref(x, adj, layer_params,
                     heads=HEADS, hidden=HIDDEN, out_ch=OUT_CH)

    assert out.shape == (N, OUT_CH), out.shape
    max_err = float(jnp.max(jnp.abs(out - ref)))
    assert jnp.allclose(out, ref, atol=5e-2, rtol=5e-2), max_err

    print("KERNEL_OK")
</pallas_src>

<mosaic_0001>
module attributes {stable_mosaic.version = 11 : i64} {
  func.func @proj_kernel(%arg0: i32, %arg1: memref<64x8xf32, #tpu.memory_space<vmem>>, %arg2: memref<8x32xf32, #tpu.memory_space<vmem>>, %arg3: memref<32x2xf32, #tpu.memory_space<vmem>>, %arg4: memref<64x32xbf16, #tpu.memory_space<vmem>>, %arg5: memref<64x2xf32, #tpu.memory_space<vmem>>) attributes {dimension_semantics = [#tpu.dimension_semantics<parallel>], iteration_bounds = array<i64: 4>, scalar_prefetch = 0 : i64, scratch_operands = 0 : i64, tpu.core_type = #tpu.core_type<tc>, window_params = [{transform_indices = @transform_0, window_bounds = array<i64: 64, 8>}, {pipeline_mode = #tpu.pipeline_mode<synchronous>, transform_indices = @transform_1, window_bounds = array<i64: 8, 32>}, {pipeline_mode = #tpu.pipeline_mode<synchronous>, transform_indices = @transform_2, window_bounds = array<i64: 32, 2>}, {transform_indices = @transform_3, window_bounds = array<i64: 64, 32>}, {transform_indices = @transform_4, window_bounds = array<i64: 64, 2>}]} {
    %c0 = arith.constant 0 : index
    %c0_0 = arith.constant 0 : index
    %0 = vector.load %arg1[%c0, %c0_0] : memref<64x8xf32, #tpu.memory_space<vmem>>, vector<64x8xf32>
    %1 = arith.truncf %0 : vector<64x8xf32> to vector<64x8xbf16>
    %c0_1 = arith.constant 0 : index
    %c0_2 = arith.constant 0 : index
    %2 = vector.load %arg2[%c0_1, %c0_2] : memref<8x32xf32, #tpu.memory_space<vmem>>, vector<8x32xf32>
    %3 = arith.truncf %2 : vector<8x32xf32> to vector<8x32xbf16>
    %cst = arith.constant dense<0.000000e+00> : vector<64x32xf32>
    %4 = tpu.matmul %1, %3, %cst {dimension_numbers = #tpu.dot_dimension_numbers<[1], [0], [0], [1], [0, 0, 1, 1], [], []>} : vector<64x8xbf16>, vector<8x32xbf16>, vector<64x32xf32> -> vector<64x32xf32>
    %c0_3 = arith.constant 0 : index
    %c0_4 = arith.constant 0 : index
    %5 = vector.load %arg3[%c0_3, %c0_4] : memref<32x2xf32, #tpu.memory_space<vmem>>, vector<32x2xf32>
    %cst_5 = arith.constant dense<0.000000e+00> : vector<64x2xf32>
    %6 = tpu.matmul %4, %5, %cst_5 {dimension_numbers = #tpu.dot_dimension_numbers<[1], [0], [0], [1], [0, 0, 1, 1], [], []>} : vector<64x32xf32>, vector<32x2xf32>, vector<64x2xf32> -> vector<64x2xf32>
    %c0_6 = arith.constant 0 : index
    %c0_7 = arith.constant 0 : index
    %7 = vector.load %arg5[%c0_6, %c0_7] : memref<64x2xf32, #tpu.memory_space<vmem>>, vector<64x2xf32>
    tpu.vector_store %arg5[%c0_6, %c0_7], %6 {strides = array<i32>} : memref<64x2xf32, #tpu.memory_space<vmem>>, vector<64x2xf32>,
    %8 = arith.truncf %4 : vector<64x32xf32> to vector<64x32xbf16>
    %c0_8 = arith.constant 0 : index
    %c0_9 = arith.constant 0 : index
    %9 = vector.load %arg4[%c0_8, %c0_9] : memref<64x32xbf16, #tpu.memory_space<vmem>>, vector<64x32xbf16>
    tpu.vector_store %arg4[%c0_8, %c0_9], %8 {strides = array<i32>} : memref<64x32xbf16, #tpu.memory_space<vmem>>, vector<64x32xbf16>,
    return
  }
  func.func @transform_0(%arg0: i32) -> (i32, i32) {
    %c0_i32 = arith.constant 0 : i32
    %c0_i32_0 = arith.constant 0 : i32
    return %arg0, %c0_i32 : i32, i32
  }
  func.func @transform_1(%arg0: i32) -> (i32, i32) {
    %c0_i32 = arith.constant 0 : i32
    %c0_i32_0 = arith.constant 0 : i32
    %c0_i32_1 = arith.constant 0 : i32
    return %c0_i32, %c0_i32_0 : i32, i32
  }
  func.func @transform_2(%arg0: i32) -> (i32, i32) {
    %c0_i32 = arith.constant 0 : i32
    %c0_i32_0 = arith.constant 0 : i32
    %c0_i32_1 = arith.constant 0 : i32
    return %c0_i32, %c0_i32_0 : i32, i32
  }
  func.func @transform_3(%arg0: i32) -> (i32, i32) {
    %c0_i32 = arith.constant 0 : i32
    %c0_i32_0 = arith.constant 0 : i32
    return %arg0, %c0_i32 : i32, i32
  }
  func.func @transform_4(%arg0: i32) -> (i32, i32) {
    %c0_i32 = arith.constant 0 : i32
    %c0_i32_0 = arith.constant 0 : i32
    return %arg0, %c0_i32 : i32, i32
  }
}

</mosaic_0001>

<bundles_post_ra>
// kernel: tpu_custom_call.1
= control target key start
LH: loop header
LB: loop body
LE: loop exit
PB: predicated region body
PF: predicated region fallthrough
CT: control target
= control target key end

     0   :  { %s533_s15 = smov 0   ;;  %s596_s0 = inlined_call_operand.vmem [shape: f32[256,8], index: 0, kind: input, shape index: {}]   ;;  %s597_s1 = inlined_call_operand.vmem [shape: f32[8,32], index: 1, kind: input, shape index: {}]   ;;  %s598_s2 = inlined_call_operand.vmem [shape: f32[32,2], index: 2, kind: input, shape index: {}]   ;;  %s599_s3 = inlined_call_operand.vmem [shape: bf16[256,32], index: 3, kind: output, shape index: {0}]   ;;  %s600_s4 = inlined_call_operand.vmem [shape: f32[256,2], index: 4, kind: output, shape index: {1}]  }
   0x1 LB: > { %s462_s16 = sadd.s32 4294967295, %s506_s15   ;;  %p466_p0 = scmp.ge.s32.totalorder %s506_s15, 1  ;;  %s506_s15 = sphi %s533_s15, %s15_s15  }
   0x2   : > { %p166_p1 = scmp.lt.s32.totalorder %s506_s15, 5 }
   0x4   : > { %p167_p2 = pnand %p466_p0, %p166_p1 }
   0x5   : > { %s467_s19 = sshll.u32 (!%p167_p2), %s462_s16, 3 }
   0x6   : > { %170 = sbr.rel (%p167_p2) target bundleno = 323 (0x143), region = 32  ;;  %p198_p3 = scmp.lt.s32.totalorder (!%p167_p2), %s467_s19, 31 }
   0xb   : > { %v228_v0 = vld [vmem:[%s597_s1] sm:$0xff]  ;;  %vm243_vm0 = vcmask 1043456   ;;  %s602_s19 = smov (!%p198_p3, %s467_s19), 31  ;;  %vm230_vm1 = vcmask 64512   ;;  %v279_v9 = vld [vmem:[%s598_s2 + $0x18] sm:$0xff]  ;;  %v278_v10 = vld [vmem:[%s598_s2 + $0x10] sm:$0xff] }
   0xc   : > { %v229_v1 = vpack.c.bf16 %v228_v0, %v228_v0  ;;  %s468_s20 = sshll.u32 %s602_s19, 3  ;;  %317 = vmatpush.msra.mxu1 %v279_v9  ;;  %488 = vmatpush.msra.mxu2 %v279_v9  ;;  %v277_v11 = vld [vmem:[%s598_s2 + $0x8] sm:$0xff]  ;;  %v276_v18 = vld [vmem:[%s598_s2] sm:$0xff]  ;;  %vm280_vm2 = vcmask 261120   ;;  %s470_s6 = sshll.u32 %s602_s19, 2  ;;  %vm363_vm3 = vcmask 257024  }
   0xd   : > { %s201_s23 = scalar_lea.vmem %s596_s0, %s468_s20  ;;  %s207_s9 = scalar_lea.vmem %s599_s3, %s470_s6  ;;  %vm346_vm4 = vcmask 15360  }
   0xe   : > { %v245_v2 = vsel %vm243_vm0, %v229_v1, 0  ;;  %v216_v3 = vld [vmem:[%s201_s23] sm:$0xff]  ;;  %v217_v4 = vld [vmem:[%s201_s23 + $0x8] sm:$0xff]  ;;  %v218_v5 = vld [vmem:[%s201_s23 + $0x10] sm:$0xff]  ;;  %318 = vmatpush.msra.mxu1 %v278_v10  ;;  %489 = vmatpush.msra.mxu2 %v278_v10  ;;  %s213_s12 = scalar_lea.vmem %s600_s4, %s468_s20 }
   0xf   : > { %254 = vmatpush.bf16.msra.mxu0 %v245_v2  ;;  %487 = vmatpush.bf16.msra.mxu3 %v245_v2  ;;  %v224_v6 = vpack.c.bf16 %v217_v4, %v216_v3  ;;  %v219_v7 = vld [vmem:[%s201_s23 + $0x18] sm:$0xff]  ;;  %v220_v12 = vld [vmem:[%s201_s23 + $0x20] sm:$0xff]  ;;  %v221_v13 = vld [vmem:[%s201_s23 + $0x28] sm:$0xff] }
  0x10   : > { %v225_v8 = vpack.c.bf16 %v219_v7, %v218_v5  ;;  %319 = vmatpush.msra.mxu1 %v277_v11  ;;  %490 = vmatpush.msra.mxu2 %v277_v11  ;;  %v226_v14 = vpack.c.bf16 %v221_v13, %v220_v12  ;;  %v222_v15 = vld [vmem:[%s201_s23 + $0x30] sm:$0xff]  ;;  %v223_v16 = vld [vmem:[%s201_s23 + $0x38] sm:$0xff] }
  0x11   : > { %v227_v17 = vpack.c.bf16 %v223_v16, %v222_v15 }
  0x12   : > { %473 = vmatmul.msk.bf16.vlgmr.msra.gmra.mxu0 %vm230_vm1, %v224_v6  ;;  %474 = vmatmul.msk.bf16.vlgmr.msra.gmra.mxu3 %vm230_vm1, %v225_v8 }
  0x13   : > { %320 = vmatpush.msra.mxu1 %v276_v18  ;;  %491 = vmatpush.msra.mxu2 %v276_v18 }
  0x22   : > { %475 = vmatmul.msk.bf16.gmra.mxu3 %vm230_vm1, %v226_v14 }
  0x32   : > { %476 = vmatmul.msk.bf16.gmra.mxu3 %vm230_vm1, %v227_v17 }
  0x8f   : > { %v256_v19 = vpop.f32.mrf.mxu0 }
  0x90   : > { %v355_v20 = vpack.c.bf16 %v256_v19, %v256_v19  ;;  %477 = vmatmul.msk.f32.vlgmr.msra.gmra.mxu1 %vm280_vm2, %v256_v19 }
  0x92   : > { %364 = vst.msk [vmem:[%s207_s9] sm:$0xf] %vm363_vm3, %v355_v20 }
  0x95   : > { %v261_v21 = vpop.f32.mrf.mxu3 }
  0x96   : > { %v357_v22 = vpack.c.bf16 %v261_v21, %v261_v21 }
  0x97   : > { %v258_v23 = vpop.f32.mrf.mxu0 }
  0x98   : > { %v356_v24 = vpack.c.bf16 %v258_v23, %v258_v23  ;;  %478 = vmatmul.msk.f32.gmra.mxu1 %vm280_vm2, %v258_v23  ;;  %366 = vst.msk [vmem:[%s207_s9 + $0x8] sm:$0xf] %vm363_vm3, %v357_v22 }
  0x9a   : > { %365 = vst.msk [vmem:[%s207_s9 + $0x4] sm:$0xf] %vm363_vm3, %v356_v24 }
  0x9d   : > { %v263_v25 = vpop.f32.mrf.mxu3 }
  0x9e   : > { %v358_v26 = vpack.c.bf16 %v263_v25, %v263_v25 }
  0xa0   : > { %479 = vmatmul.msk.f32.gmra.mxu1 %vm280_vm2, %v261_v21  ;;  %367 = vst.msk [vmem:[%s207_s9 + $0xc] sm:$0xf] %vm363_vm3, %v358_v26 }
  0xa5   : > { %v266_v27 = vpop.f32.mrf.mxu3 }
  0xa6   : > { %v359_v28 = vpack.c.bf16 %v266_v27, %v266_v27  ;;  %481 = vmatmul.msk.f32.vlgmr.msra.gmra.mxu2 %vm280_vm2, %v266_v27 }
  0xa8   : > { %480 = vmatmul.msk.f32.gmra.mxu1 %vm280_vm2, %v263_v25  ;;  %368 = vst.msk [vmem:[%s207_s9 + $0x10] sm:$0xf] %vm363_vm3, %v359_v28 }
  0xad   : > { %v268_v29 = vpop.f32.mrf.mxu3 }
  0xae   : > { %v360_v30 = vpack.c.bf16 %v268_v29, %v268_v29  ;;  %482 = vmatmul.msk.f32.gmra.mxu2 %vm280_vm2, %v268_v29 }
  0xb0   : > { %369 = vst.msk [vmem:[%s207_s9 + $0x14] sm:$0xf] %vm363_vm3, %v360_v30 }
  0xb5   : > { %v271_v31 = vpop.f32.mrf.mxu3 }
  0xb6   : > { %v361_v32 = vpack.c.bf16 %v271_v31, %v271_v31  ;;  %483 = vmatmul.msk.f32.gmra.mxu2 %vm280_vm2, %v271_v31 }
  0xb8   : > { %370 = vst.msk [vmem:[%s207_s9 + $0x18] sm:$0xf] %vm363_vm3, %v361_v32 }
  0xbd   : > { %v273_v33 = vpop.f32.mrf.mxu3 }
  0xbe   : > { %v362_v34 = vpack.c.bf16 %v273_v33, %v273_v33  ;;  %484 = vmatmul.msk.f32.gmra.mxu2 %vm280_vm2, %v273_v33 }
  0xc0   : > { %371 = vst.msk [vmem:[%s207_s9 + $0x1c] sm:$0xf] %vm363_vm3, %v362_v34 }
 0x10d   : > { %v322_v35 = vpop.f32.mrf.mxu1 }
 0x10e   : > { %347 = vst.msk [vmem:[%s213_s12] sm:$0xff] %vm346_vm4, %v322_v35 }
 0x115   : > { %v325_v36 = vpop.f32.mrf.mxu1 }
 0x116   : > { %348 = vst.msk [vmem:[%s213_s12 + $0x8] sm:$0xff] %vm346_vm4, %v325_v36 }
 0x11d   : > { %v328_v37 = vpop.f32.mrf.mxu1 }
 0x11e   : > { %349 = vst.msk [vmem:[%s213_s12 + $0x10] sm:$0xff] %vm346_vm4, %v328_v37 }
 0x125   : > { %v331_v38 = vpop.f32.mrf.mxu1 }
 0x126   : > { %350 = vst.msk [vmem:[%s213_s12 + $0x18] sm:$0xff] %vm346_vm4, %v331_v38 }
 0x129   : > { %v334_v39 = vpop.f32.mrf.mxu2 }
 0x12a   : > { %351 = vst.msk [vmem:[%s213_s12 + $0x20] sm:$0xff] %vm346_vm4, %v334_v39 }
 0x131   : > { %v337_v40 = vpop.f32.mrf.mxu2 }
 0x132   : > { %352 = vst.msk [vmem:[%s213_s12 + $0x28] sm:$0xff] %vm346_vm4, %v337_v40 }
 0x139   : > { %v340_v41 = vpop.f32.mrf.mxu2 }
 0x13a   : > { %353 = vst.msk [vmem:[%s213_s12 + $0x30] sm:$0xff] %vm346_vm4, %v340_v41 }
 0x141   : > { %v343_v42 = vpop.f32.mrf.mxu2 }
 0x142   : > { %354 = vst.msk [vmem:[%s213_s12 + $0x38] sm:$0xff] %vm346_vm4, %v343_v42 }
 0x143 PF: > { %s15_s15 = sadd.s32 1, %s506_s15  }
 0x144   : > { %p12_p4 = scmp.ge.s32.totalorder %s15_s15, 6  }
 0x146   :  { %14 = sbr.rel (!%p12_p4) target bundleno = 1 (0x1), region = 74 }

</bundles_post_ra>
